<compile_context>
chip_gen: v7x
topology: tpu7x:2x2x1
jax: 0.10.0
libtpu: 0.0.40
codegen_flags: <defaults>
</compile_context>

<pallas_src>
import math

import jax
import jax.numpy as jnp
from jax.experimental import pallas as pl
from jax.experimental.pallas import tpu as pltpu


# ----------------------------------------------------------------------------
# Stage 1: fused encoder + L2 score, tiled over rows of the batch.
# ----------------------------------------------------------------------------
def _score_kernel(x_ref, y_ref, w1_ref, b1_ref, w2_ref, score_ref):
    mm = w1_ref.dtype
    # Layer 1 for x and y: MXU matmul with f32 accumulation, bias+ReLU in f32.
    hx = jnp.dot(x_ref[...].astype(mm), w1_ref[...],
                 preferred_element_type=jnp.float32) + b1_ref[...]       # [tm, H]
    hy = jnp.dot(y_ref[...].astype(mm), w1_ref[...],
                 preferred_element_type=jnp.float32) + b1_ref[...]       # [tm, H]
    # Subtract BEFORE layer 2: (relu(hx) - relu(hy)) @ w2 ; b2 cancels exactly.
    dh = jnp.maximum(hx, 0.0) - jnp.maximum(hy, 0.0)                     # f32 [tm, H]
    d = jnp.dot(dh.astype(w2_ref.dtype), w2_ref[...],
                preferred_element_type=jnp.float32)                      # f32 [tm, D_enc]
    sq = jnp.sum(d * d, axis=-1, keepdims=True)                          # [tm, 1]
    # Sublane->lane transpose is a single XLU op (free slot); gives a lane-dense
    # [1, tm] score slice.
    score_ref[...] = jnp.sqrt(sq).T


# ----------------------------------------------------------------------------
# Stage 2: expand the [1, B] score row into the two [B, B] outputs, tiled on a
# 2-D grid (columns outer so the score block is only re-fetched per column).
# Element (i, j) = score[j] on/off the diagonal (matches the torch broadcast of
# a [B] vector against [B, B]).
# ----------------------------------------------------------------------------
def _expand_kernel(score_ref, joint_ref, marg_ref):
    tr, tc = joint_ref.shape
    c0 = pl.program_id(0) * tc            # grid axis 0 = column blocks (outer)
    r0 = pl.program_id(1) * tr            # grid axis 1 = row blocks (inner)
    rows = jax.lax.broadcasted_iota(jnp.int32, (tr, tc), 0) + r0
    cols = jax.lax.broadcasted_iota(jnp.int32, (tr, tc), 1) + c0
    diag = rows == cols

    bcast = jnp.broadcast_to(score_ref[...], (tr, tc))                   # score[j] per column
    joint = jnp.where(diag, bcast, 0.0)
    joint_ref[...] = joint
    marg_ref[...] = bcast - joint


# ----------------------------------------------------------------------------
# VMEM-limit helpers (sized to the tile footprint, capped for v7x's 64 MiB).
# ----------------------------------------------------------------------------
def _score_vmem_limit(tm, d_in, h, d_enc, w_itemsize):
    acts = 2 * 2 * tm * d_in * 4                      # x & y f32 tiles, double-buffered
    wts = 2 * (d_in * h + h * d_enc) * w_itemsize     # resident weights (2 bufs worst case)
    tmp = (3 * h + d_enc + 4) * tm * 4                # hx, hy, dh, d, sq intermediates
    out = 2 * tm * 4 + 8 * (h + d_enc)                # score slice + biases
    need = acts + wts + tmp + out
    # TODO(synk): for very wide encoders whose weights alone exceed ~32 MiB,
    # stream w1/w2 with pltpu.emit_pipeline instead of keeping them resident.
    return int(min(max(32 << 20, int(1.5 * need)), 48 << 20))


def _expand_vmem_limit(tr, tc):
    need = 2 * 2 * tr * tc * 4 + 2 * tc * 4           # 2 outputs x 2 buffers + score row
    return int(min(max(24 << 20, 2 * need), 48 << 20))


# ----------------------------------------------------------------------------
# Wrapper.
# ----------------------------------------------------------------------------
def prepare_encoder_params(w1, b1, w2, b2, matmul_dtype=jnp.bfloat16):
    """One-time parameter prep: weights in the MXU dtype, biases in f32.
    b2 cancels in (E(x) - E(y)) and is therefore dropped."""
    del b2
    return (w1.astype(matmul_dtype),
            b1.reshape(1, -1).astype(jnp.float32),
            w2.astype(matmul_dtype))


def l2_critic(x, y, params):
    w1, b1, w2 = params
    B, D_in = x.shape
    H = w1.shape[1]
    D_enc = w2.shape[1]
    w_itemsize = jnp.dtype(w1.dtype).itemsize

    # --- Stage 1: per-row-tile encoder + L2 score -> lane-dense [1, B] row. ---
    tm = B if B <= 256 else 256                       # full-extent block or 128-multiple
    n_row = pl.cdiv(B, tm)

    score = pl.pallas_call(
        _score_kernel,
        out_shape=jax.ShapeDtypeStruct((1, B), jnp.float32),
        grid=(n_row,),
        in_specs=[
            pl.BlockSpec((tm, D_in), lambda i: (i, 0)),       # x rows
            pl.BlockSpec((tm, D_in), lambda i: (i, 0)),       # y rows
            pl.BlockSpec((D_in, H), lambda i: (0, 0)),        # w1 (VMEM-resident)
            pl.BlockSpec((1, H), lambda i: (0, 0)),           # b1
            pl.BlockSpec((H, D_enc), lambda i: (0, 0)),       # w2 (VMEM-resident)
        ],
        out_specs=pl.BlockSpec((1, tm), lambda i: (0, i)),
        compiler_params=pltpu.CompilerParams(
            dimension_semantics=("parallel",),
            vmem_limit_bytes=_score_vmem_limit(tm, D_in, H, D_enc, w_itemsize)),
        cost_estimate=pl.CostEstimate(
            flops=4 * B * D_in * H + 2 * B * H * D_enc + B * (5 * H + 3 * D_enc),
            transcendentals=B,
            bytes_accessed=(2 * B * D_in) * 4
            + (D_in * H + H * D_enc) * w_itemsize + 4 * (H + B),
        ),
    )(x, y, w1, b1, w2)

    # --- Stage 2: tiled, lane-dense expansion into the two [B, B] outputs. ---
    # Fixed lane-dense tiles + cdiv grid (ragged last blocks are masked), so the
    # working set stays bounded for any B.
    tr = B if B <= 512 else 512
    tc = B if B <= 1024 else 1024
    grid = (pl.cdiv(B, tc), pl.cdiv(B, tr))           # columns outer, rows inner

    # TODO(synk): if the consumer accepts the [B] score (or bf16 outputs), skip
    # materializing the dense joint matrix / halve the HBM writes.
    joint, marginal = pl.pallas_call(
        _expand_kernel,
        out_shape=(
            jax.ShapeDtypeStruct((B, B), jnp.float32),
            jax.ShapeDtypeStruct((B, B), jnp.float32),
        ),
        grid=grid,
        in_specs=[pl.BlockSpec((1, tc), lambda j, i: (0, j))],   # changes on outer axis only
        out_specs=(
            pl.BlockSpec((tr, tc), lambda j, i: (i, j)),
            pl.BlockSpec((tr, tc), lambda j, i: (i, j)),
        ),
        compiler_params=pltpu.CompilerParams(
            dimension_semantics=("parallel", "parallel"),
            vmem_limit_bytes=_expand_vmem_limit(tr, tc)),
        cost_estimate=pl.CostEstimate(
            flops=2 * B * B,
            transcendentals=0,
            bytes_accessed=4 * B + 8 * B * B,
        ),
    )(score)
    return joint, marginal


# ----------------------------------------------------------------------------
# Deterministic init + pure-JAX reference for verification.
# ----------------------------------------------------------------------------
def init_linear(key, fan_in, fan_out):
    """torch.nn.Linear-style uniform init; weight stored [in, out]."""
    bound = 1.0 / math.sqrt(fan_in)
    kw, kb = jax.random.split(key)
    w = jax.random.uniform(kw, (fan_in, fan_out), jnp.float32, -bound, bound)
    b = jax.random.uniform(kb, (1, fan_out), jnp.float32, -bound, bound)
    return w, b


def reference(x, y, w1, b1, w2, b2):
    def enc(v):
        h = jnp.maximum(v @ w1 + b1, 0.0)
        return h @ w2 + b2

    d = enc(x) - enc(y)
    score = jnp.sqrt(jnp.sum(d * d, axis=-1))                            # [B]
    eye = jnp.eye(x.shape[0], dtype=jnp.float32)
    return score * eye, score * (1.0 - eye)


if __name__ == "__main__":
    B, D_in, H, D_enc = 8, 32, 64, 32

    key = jax.random.PRNGKey(0)
    kx, ky, k1, k2, k3, k4 = jax.random.split(key, 6)

    x = jax.random.normal(kx, (B, D_in), jnp.float32)
    y = jax.random.normal(ky, (B, D_in), jnp.float32)

    # x_encoder params (used for both x and y, exactly as in the PyTorch forward).
    w1, b1 = init_linear(k1, D_in, H)
    w2, b2 = init_linear(k2, H, D_enc)
    # y_encoder params exist in __init__ but are never used by forward; init for parity.
    _w1y, _b1y = init_linear(k3, D_in, H)
    _w2y, _b2y = init_linear(k4, H, D_enc)

    ref_joint, ref_marginal = reference(x, y, w1, b1, w2, b2)

    # Exact-precision path (f32 matmuls) — tight check against the reference.
    params_f32 = prepare_encoder_params(w1, b1, w2, b2, matmul_dtype=jnp.float32)
    j32, m32 = l2_critic(x, y, params_f32)
    jax.block_until_ready((j32, m32))
    assert jnp.allclose(j32, ref_joint, atol=1e-4, rtol=1e-4)
    assert jnp.allclose(m32, ref_marginal, atol=1e-4, rtol=1e-4)

    # Fast path (bf16 MXU inputs, f32 accumulation, f32 x-y difference).
    params_bf16 = prepare_encoder_params(w1, b1, w2, b2, matmul_dtype=jnp.bfloat16)
    joint, marginal = l2_critic(x, y, params_bf16)
    jax.block_until_ready((joint, marginal))
    assert jnp.allclose(joint, ref_joint, atol=5e-2, rtol=5e-2)
    assert jnp.allclose(marginal, ref_marginal, atol=5e-2, rtol=5e-2)

    print("KERNEL_OK")
</pallas_src>

<mosaic_0001>
module attributes {stable_mosaic.version = 11 : i64} {
  func.func @_score_kernel(%arg0: i32, %arg1: memref<8x32xf32, #tpu.memory_space<vmem>>, %arg2: memref<8x32xf32, #tpu.memory_space<vmem>>, %arg3: memref<32x64xf32, #tpu.memory_space<vmem>>, %arg4: memref<1x64xf32, #tpu.memory_space<vmem>>, %arg5: memref<64x32xf32, #tpu.memory_space<vmem>>, %arg6: memref<1x8xf32, #tpu.memory_space<vmem>>) attributes {dimension_semantics = [#tpu.dimension_semantics<parallel>], iteration_bounds = array<i64: 1>, scalar_prefetch = 0 : i64, scratch_operands = 0 : i64, tpu.core_type = #tpu.core_type<tc>, window_params = [{transform_indices = @transform_0, window_bounds = array<i64: 8, 32>}, {transform_indices = @transform_1, window_bounds = array<i64: 8, 32>}, {pipeline_mode = #tpu.pipeline_mode<synchronous>, transform_indices = @transform_2, window_bounds = array<i64: 32, 64>}, {pipeline_mode = #tpu.pipeline_mode<synchronous>, transform_indices = @transform_3, window_bounds = array<i64: 1, 64>}, {pipeline_mode = #tpu.pipeline_mode<synchronous>, transform_indices = @transform_4, window_bounds = array<i64: 64, 32>}, {transform_indices = @transform_5, window_bounds = array<i64: 1, 8>}]} {
    %c0 = arith.constant 0 : index
    %c0_0 = arith.constant 0 : index
    %0 = vector.load %arg1[%c0, %c0_0] : memref<8x32xf32, #tpu.memory_space<vmem>>, vector<8x32xf32>
    %c0_1 = arith.constant 0 : index
    %c0_2 = arith.constant 0 : index
    %1 = vector.load %arg3[%c0_1, %c0_2] : memref<32x64xf32, #tpu.memory_space<vmem>>, vector<32x64xf32>
    %cst = arith.constant dense<0.000000e+00> : vector<8x64xf32>
    %2 = tpu.matmul %0, %1, %cst {dimension_numbers = #tpu.dot_dimension_numbers<[1], [0], [0], [1], [0, 0, 1, 1], [], []>} : vector<8x32xf32>, vector<32x64xf32>, vector<8x64xf32> -> vector<8x64xf32>
    %c0_3 = arith.constant 0 : index
    %c0_4 = arith.constant 0 : index
    %3 = vector.load %arg4[%c0_3, %c0_4] : memref<1x64xf32, #tpu.memory_space<vmem>>, vector<1x64xf32>
    %4 = vector.broadcast %3 : vector<1x64xf32> to vector<8x64xf32>
    %5 = arith.addf %2, %4 : vector<8x64xf32>
    %c0_5 = arith.constant 0 : index
    %c0_6 = arith.constant 0 : index
    %6 = vector.load %arg2[%c0_5, %c0_6] : memref<8x32xf32, #tpu.memory_space<vmem>>, vector<8x32xf32>
    %c0_7 = arith.constant 0 : index
    %c0_8 = arith.constant 0 : index
    %7 = vector.load %arg3[%c0_7, %c0_8] : memref<32x64xf32, #tpu.memory_space<vmem>>, vector<32x64xf32>
    %cst_9 = arith.constant dense<0.000000e+00> : vector<8x64xf32>
    %8 = tpu.matmul %6, %7, %cst_9 {dimension_numbers = #tpu.dot_dimension_numbers<[1], [0], [0], [1], [0, 0, 1, 1], [], []>} : vector<8x32xf32>, vector<32x64xf32>, vector<8x64xf32> -> vector<8x64xf32>
    %c0_10 = arith.constant 0 : index
    %c0_11 = arith.constant 0 : index
    %9 = vector.load %arg4[%c0_10, %c0_11] : memref<1x64xf32, #tpu.memory_space<vmem>>, vector<1x64xf32>
    %10 = vector.broadcast %9 : vector<1x64xf32> to vector<8x64xf32>
    %11 = arith.addf %8, %10 : vector<8x64xf32>
    %cst_12 = arith.constant 0.000000e+00 : f32
    %12 = vector.broadcast %cst_12 : f32 to vector<8x64xf32>
    %13 = arith.maximumf %5, %12 : vector<8x64xf32>
    %cst_13 = arith.constant 0.000000e+00 : f32
    %14 = vector.broadcast %cst_13 : f32 to vector<8x64xf32>
    %15 = arith.maximumf %11, %14 : vector<8x64xf32>
    %16 = arith.subf %13, %15 : vector<8x64xf32>
    %c0_14 = arith.constant 0 : index
    %c0_15 = arith.constant 0 : index
    %17 = vector.load %arg5[%c0_14, %c0_15] : memref<64x32xf32, #tpu.memory_space<vmem>>, vector<64x32xf32>
    %cst_16 = arith.constant dense<0.000000e+00> : vector<8x32xf32>
    %18 = tpu.matmul %16, %17, %cst_16 {dimension_numbers = #tpu.dot_dimension_numbers<[1], [0], [0], [1], [0, 0, 1, 1], [], []>} : vector<8x64xf32>, vector<64x32xf32>, vector<8x32xf32> -> vector<8x32xf32>
    %19 = arith.mulf %18, %18 : vector<8x32xf32>
    %cst_17 = arith.constant dense<0.000000e+00> : vector<8xf32>
    %20 = vector.multi_reduction <add>, %19, %cst_17 [1] : vector<8x32xf32> to vector<8xf32>
    %21 = vector.shape_cast %20 : vector<8xf32> to vector<8x1xf32>
    %22 = math.sqrt %21 : vector<8x1xf32>
    %23 = tpu.transpose %22, [1, 0] : vector<8x1xf32> -> vector<1x8xf32>
    %c0_18 = arith.constant 0 : index
    %c0_19 = arith.constant 0 : index
    %24 = vector.load %arg6[%c0_18, %c0_19] : memref<1x8xf32, #tpu.memory_space<vmem>>, vector<1x8xf32>
    tpu.vector_store %arg6[%c0_18, %c0_19], %23 {strides = array<i32>} : memref<1x8xf32, #tpu.memory_space<vmem>>, vector<1x8xf32>,
    return
  }
  func.func @transform_0(%arg0: i32) -> (i32, i32) {
    %c0_i32 = arith.constant 0 : i32
    %c0_i32_0 = arith.constant 0 : i32
    return %arg0, %c0_i32 : i32, i32
  }
  func.func @transform_1(%arg0: i32) -> (i32, i32) {
    %c0_i32 = arith.constant 0 : i32
    %c0_i32_0 = arith.constant 0 : i32
    return %arg0, %c0_i32 : i32, i32
  }
  func.func @transform_2(%arg0: i32) -> (i32, i32) {
    %c0_i32 = arith.constant 0 : i32
    %c0_i32_0 = arith.constant 0 : i32
    %c0_i32_1 = arith.constant 0 : i32
    return %c0_i32, %c0_i32_0 : i32, i32
  }
  func.func @transform_3(%arg0: i32) -> (i32, i32) {
    %c0_i32 = arith.constant 0 : i32
    %c0_i32_0 = arith.constant 0 : i32
    %c0_i32_1 = arith.constant 0 : i32
    return %c0_i32, %c0_i32_0 : i32, i32
  }
  func.func @transform_4(%arg0: i32) -> (i32, i32) {
    %c0_i32 = arith.constant 0 : i32
    %c0_i32_0 = arith.constant 0 : i32
    %c0_i32_1 = arith.constant 0 : i32
    return %c0_i32, %c0_i32_0 : i32, i32
  }
  func.func @transform_5(%arg0: i32) -> (i32, i32) {
    %c0_i32 = arith.constant 0 : i32
    %c0_i32_0 = arith.constant 0 : i32
    return %c0_i32, %arg0 : i32, i32
  }
}

</mosaic_0001>

<bundles_post_ra>
// kernel: tpu_custom_call.1
= control target key start
LH: loop header
LB: loop body
LE: loop exit
PB: predicated region body
PF: predicated region fallthrough
CT: control target
= control target key end

     0   :  { %v443_v3 = vmov 0.0|0.0   ;;  %vm444_vm0 = vmmov 0   ;;  %v445_v6 = vmov 0.0   ;;  %s537_s0 = inlined_call_operand.vmem [shape: f32[8,32], index: 0, kind: input, shape index: {}]   ;;  %s538_s1 = inlined_call_operand.vmem [shape: f32[8,32], index: 1, kind: input, shape index: {}]   ;;  %s539_s2 = inlined_call_operand.vmem [shape: f32[32,64], index: 2, kind: input, shape index: {}]   ;;  %s540_s3 = inlined_call_operand.vmem [shape: f32[1,64], index: 3, kind: input, shape index: {}]   ;;  %s541_s4 = inlined_call_operand.vmem [shape: f32[64,32], index: 4, kind: input, shape index: {}]   ;;  %s542_s5 = inlined_call_operand.hbm [shape: f32[1,8], index: 5, kind: output, shape index: {}]  }
   0x1   :  { %v22_v0 = vld [vmem:[%s539_s2] sm:$0xff]  ;;  %v23_v1 = vld [vmem:[%s539_s2 + $0x8] sm:$0xff]  ;;  %v24_v2 = vld [vmem:[%s539_s2 + $0x10] sm:$0xff]  ;;  %389 = vmatprep.subr.bf16.mxu1 %v443_v3  ;;  %356 = vmatprep.mubr.msk.f32.mxu1 %vm444_vm0, %v445_v6 }
   0x2   :  { %v390_v4 = vpack.c.bf16 %v23_v1, %v22_v0  ;;  %v25_v5 = vld [vmem:[%s539_s2 + $0x18] sm:$0xff]  ;;  %401 = vmatprep.subr.bf16.mxu0 %v443_v3  ;;  %386 = vmatprep.mubr.msk.f32.mxu0 %vm444_vm0, %v445_v6 }
   0x3   :  { %10 = vsyncpa [#allocation3], 0  ;;  %v393_v7 = vpack.c.bf16 %v25_v5, %v24_v2  ;;  %v21_v8 = vld [vmem:[%s537_s0] sm:$0xff]  ;;  %vm33_vm1 = vcmask 261120   ;;  %v185_v11 = vld [vmem:[%s541_s4 + $0x8] sm:$0xff]  ;;  %vm192_vm2 = vcmask 523264  }
   0x4   :  { %391 = vmatpush3.bf16.msra.mxu1 %v390_v4  ;;  %v107_v9 = vld [vmem:[%s538_s1] sm:$0xff]  ;;  %v186_v13 = vld [vmem:[%s541_s4 + $0x10] sm:$0xff]  ;;  %v187_v14 = vld [vmem:[%s541_s4 + $0x18] sm:$0xff]  ;;  %vm309_vm5 = vcmask 57344  }
   0x5   :  { %392 = vmatprep.subr.bf16.mxu1 %v443_v3  ;;  %v184_v10 = vld [vmem:[%s541_s4] sm:$0xff]  ;;  %v405_v15 = vpack.c.bf16 %v187_v14, %v186_v13  ;;  %v189_v17 = vld [vmem:[%s541_s4 + $0x28] sm:$0xff]  ;;  %v190_v19 = vld [vmem:[%s541_s4 + $0x30] sm:$0xff] }
   0x6   :  { %v402_v12 = vpack.c.bf16 %v185_v11, %v184_v10  ;;  %v188_v16 = vld [vmem:[%s541_s4 + $0x20] sm:$0xff]  ;;  %v191_v20 = vld [vmem:[%s541_s4 + $0x38] sm:$0xff] }
   0x7   :  { %v408_v18 = vpack.c.bf16 %v189_v17, %v188_v16  ;;  %v411_v21 = vpack.c.bf16 %v191_v20, %v190_v19  ;;  %v325_v24 = vld [vmem:[%s540_s3] ss:$0 sm:$0xff]  ;;  %s446_s3 = smov [#allocation2]  }
   0x8   :  { %394 = vmatpush3.bf16.msra.mxu1 %v393_v7  ;;  %403 = vmatpush3.bf16.msra.mxu0 %v402_v12  ;;  %s317_s4 = sshll.u32 %s446_s3, 4  ;;  %s318_s4 = int_to_ptr.vmem [resolvable:$true] %s317_s4 }
   0x9   :  { %395 = vmatprep.subr.bf16.mxu1 %v443_v3  ;;  %404 = vmatprep.subr.bf16.mxu0 %v443_v3  ;;  %s419_s20 = scalar_lea.vmem %s318_s4, 16  ;;  %s423_s21 = scalar_lea.vmem %s318_s4, 32 }
   0xa   :  { %p420_p0 = scmp.ne.s32.totalorder %s318_s4, %s419_s20  ;;  %p424_p1 = scmp.lt.s32.totalorder %s318_s4, %s318_s4 }
   0xb   :  { %357 = vmatmul.mubr.msk.f32.vlgmr.msra.gmra.mrb[0].mxu1 %vm33_vm1, %v21_v8  ;;  %p425_p2 = scmp.lt.s32.totalorder %s423_s21, %s419_s20 }
   0xc   :  { %397 = vmatpush3.bf16.msra.mxu1 %v390_v4  ;;  %367 = vmatprep.mubr.msk.f32.mxu1 %vm444_vm0, %v445_v6 }
   0xd   :  { %398 = vmatprep.subr.bf16.mxu1 %v443_v3  ;;  %406 = vmatpush3.bf16.msra.mxu0 %v405_v15  ;;  %p426_p3 = por %p425_p2, %p424_p1 }
   0xe   :  { %407 = vmatprep.subr.bf16.mxu0 %v443_v3 }
   0xf   :  { %p427_p4 = pnand %p426_p3, %p420_p0 }
  0x10   :  { %400 = vmatpush3.bf16.msra.mxu1 %v393_v7 }
  0x11   :  { %409 = vmatpush3.bf16.msra.mxu0 %v408_v18 }
  0x12   :  { %410 = vmatprep.subr.bf16.mxu0 %v443_v3 }
  0x13   :  { %368 = vmatmul.mubr.msk.f32.vlgmr.msra.gmra.mrb[2].mxu1 %vm33_vm1, %v107_v9 }
  0x15   :  { %412 = vmatpush3.bf16.msra.mxu0 %v411_v21 }
  0xde   :  { %v103_v22 = vpop.f32.mrb[0].mxu1 }
  0xdf   :  { %v358_v23 = vpop.f32.mrb[1].mxu1  ;;  %v104_v25 = vadd.f32 %v325_v24, %v103_v22 }
  0xe1   :  { %v181_v29 = vmax.f32 %v104_v25, 0.0 }
  0xe6   :  { %v177_v26 = vpop.f32.mrb[2].mxu1 }
  0xe7   :  { %v178_v27 = vadd.f32 %v325_v24, %v177_v26  ;;  %v369_v28 = vpop.f32.mrb[3].mxu1 }
  0xe9   :  { %v182_v30 = vmax.f32 %v178_v27, 0.0 }
  0xeb   :  { %v183_v31 = vsub.f32 %v181_v29, %v182_v30 }
  0xed   :  { %387 = vmatmul.mubr.msk.f32.vlgmr.msra.gmra.mrb[0].mxu0 %vm192_vm2, %v183_v31 }
 0x1c0   :  { %v262_v32 = vpop.f32.mrb[0].mxu0 }
 0x1c1   :  { %v266_v33 = vmul.f32 %v262_v32, %v262_v32  ;;  %v388_v34 = vpop.f32.mrb[1].mxu0 }
 0x1c3   :  { %v267_v35 = vsel %vm33_vm1, %v266_v33, 0.0 }
 0x1c4   :  { %268 = vadd.xlane.f32.xlu0 %v267_v35 }
 0x251   :  { %v269_v36 = vpop.xlane.xlu0 %268 }
 0x252   :  { %417 = vrsqrt.f32 %v269_v36  ;;  %vm272_vm3 = vcmp.eq.f32.partialorder %v269_v36, inf  ;;  %v275_v39 = vand.u32 2147483648, %v269_v36  ;;  %vm274_vm4 = vcmp.eq.f32.partialorder %v269_v36, 0.0 }
 0x25c   :  { %v418_v37 = vpop.eup %417 }
 0x25d   :  { %v271_v38 = vmul.f32 %v418_v37, %v269_v36 }
 0x25f   :  { %v273_v40 = vsel %vm272_vm3, %v269_v36, %v271_v38 }
 0x260   :  { %v276_v41 = vsel %vm274_vm4, %v275_v39, %v273_v40 }
 0x261   :  { %277 = vxpose.xlu0.b32.start.end [1/1] (short) (narrow) %v276_v41, 8 }
 0x2e1   :  { %v293_v42 = vpop.trf.xlu0 }
 0x2e2   :  { %310 = vst.msk [vmem:[#allocation2] sm:$0x1] %vm309_vm5, %v293_v42 }
 0x2e3   :  { %430 = shalt.err (!%p427_p4)
}
 0x2e4   :  { %s431_s24 = scalar_lea.hbm %s542_s5, 16 }
 0x2e5   :  { %p432_p5 = scmp.ne.s32.totalorder %s542_s5, %s431_s24  ;;  %p435_p6 = scmp.lt.u32.totalorder %s431_s24, %s542_s5 }
 0x2e7   :  { %p437_p7 = pnand %p435_p6, %p432_p5 }
 0x2e9   :  { %440 = shalt.err (!%p437_p7)
}
 0x2ea   :  { %320 = dma.vmem_to_hbm [thread:$0]  %s318_s4, 16, %s542_s5, [#allocation3]  }
 0x2eb   :  { %441 = dma.done.wait [#allocation3], 16  }
 0x2ec   :  { %442 = vsyncadd [#allocation3], 4294967280 }
 0x2ed   :  { %324 = vsyncpa [#allocation3], 1 }

</bundles_post_ra>
